<compile_context>
chip_gen: v7x
topology: tpu7x:2x2x1
jax: 0.10.0
libtpu: 0.0.40
codegen_flags: <defaults>
</compile_context>

<pallas_src>
import functools
import numpy as np
import jax
import jax.numpy as jnp
from jax import lax
from jax.experimental import pallas as pl
from jax.experimental.pallas import tpu as pltpu


# -----------------------------------------------------------------------------
# Pallas kernels
# -----------------------------------------------------------------------------
def gru_kernel(len_ref, gates_ref, wh_ref, bh_ref, h_out_ref):
    """Whole GRU recurrence for one batch tile.

    gates_ref : (L, TB, 3H)  precomputed input gates  x @ W_ih + b_ih
    wh_ref    : (H, 3H)      fused hidden weights [W_hr|W_hz|W_hn]
    bh_ref    : (1, 3H)      fused hidden bias
    len_ref   : (TB, 1)      per-row history lengths (int32)
    h_out_ref : (TB, H)      final hidden state
    """
    L = gates_ref.shape[0]
    H = wh_ref.shape[0]

    wh = wh_ref[...]            # stays pinned in vregs across the loop
    bh = bh_ref[...]
    lens = len_ref[...]

    def step(t, h):
        gi = gates_ref[t]                                        # (TB, 3H)
        gh = jnp.dot(h, wh, preferred_element_type=jnp.float32) + bh
        r = jax.nn.sigmoid(gi[:, :H] + gh[:, :H])
        z = jax.nn.sigmoid(gi[:, H:2 * H] + gh[:, H:2 * H])
        n = jnp.tanh(gi[:, 2 * H:] + r * gh[:, 2 * H:])
        h_new = (1.0 - z) * n + z * h
        # pack_padded_sequence semantics: rows whose history length <= t keep
        # their previous hidden state (zero-length histories -> h stays 0).
        return jnp.where(t < lens, h_new, h)

    h0 = jnp.zeros(h_out_ref.shape, jnp.float32)
    h_out_ref[...] = lax.fori_loop(0, L, step, h0, unroll=True)


def linear_ce_kernel(tgt_ref, x_ref, w_ref, b_ref, logits_ref, loss_ref,
                     m_sc, l_sc, t_sc):
    """Final linear projection fused with cross-entropy.

    Grid = (batch_tiles [parallel], entity_tiles [arbitrary]).
    Online logsumexp over entity tiles; integer targets via iota compare
    (no dense one-hot).
    """
    j = pl.program_id(1)

    @pl.when(j == 0)
    def _():
        m_sc[...] = jnp.full_like(m_sc, -jnp.inf)
        l_sc[...] = jnp.zeros_like(l_sc)
        t_sc[...] = jnp.zeros_like(t_sc)

    logits = jnp.dot(x_ref[...], w_ref[...],
                     preferred_element_type=jnp.float32) + b_ref[...]
    logits_ref[...] = logits

    tile_n = logits.shape[1]
    col = j * tile_n + lax.broadcasted_iota(jnp.int32, logits.shape, 1)
    is_tgt = col == tgt_ref[...]                                  # (TB, TN)
    t_sc[...] += jnp.sum(jnp.where(is_tgt, logits, 0.0), axis=-1, keepdims=True)

    m_prev = m_sc[...]
    m_new = jnp.maximum(m_prev, jnp.max(logits, axis=-1, keepdims=True))
    l_sc[...] = (l_sc[...] * jnp.exp(m_prev - m_new)
                 + jnp.sum(jnp.exp(logits - m_new), axis=-1, keepdims=True))
    m_sc[...] = m_new

    @pl.when(j == pl.num_programs(1) - 1)
    def _():
        # per-row cross entropy: logsumexp(logits) - logits[target]
        loss_ref[...] = m_sc[...] + jnp.log(l_sc[...]) - t_sc[...]


# -----------------------------------------------------------------------------
# Pallas wrappers
# -----------------------------------------------------------------------------
def _pick_tile(n, candidates):
    for c in candidates:
        if c <= n and n % c == 0:
            return c
    return n


def gru_pallas(gates_in, lengths, w_hh, b_hh):
    """gates_in: (B2, L, 3H) precomputed input gates; returns final hidden (B2, H)."""
    B2, L, G = gates_in.shape
    H = w_hh.shape[0]
    gates_t = jnp.transpose(gates_in, (1, 0, 2))         # (L, B2, 3H) time-major
    lens2d = lengths.reshape(B2, 1).astype(jnp.int32)

    tile_b = _pick_tile(B2, (256, 128, 64, 32, 16, 8))
    nb = B2 // tile_b

    cost = pl.CostEstimate(
        flops=2 * B2 * L * H * G + 12 * B2 * L * H,
        transcendentals=3 * B2 * L * H,
        bytes_accessed=4 * (B2 * L * G + B2 + H * G + G + B2 * H))

    return pl.pallas_call(
        gru_kernel,
        out_shape=jax.ShapeDtypeStruct((B2, H), jnp.float32),
        grid=(nb,),
        in_specs=[
            pl.BlockSpec((tile_b, 1), lambda i: (i, 0)),          # lengths
            pl.BlockSpec((L, tile_b, G), lambda i: (0, i, 0)),    # input gates
            pl.BlockSpec((H, G), lambda i: (0, 0)),               # W_hh fused
            pl.BlockSpec((1, G), lambda i: (0, 0)),               # b_hh fused
        ],
        out_specs=pl.BlockSpec((tile_b, H), lambda i: (i, 0)),
        compiler_params=pltpu.CompilerParams(
            dimension_semantics=("parallel",)),
        cost_estimate=cost,
    )(lens2d, gates_t, w_hh, b_hh)


def linear_ce_pallas(x, w_t, b, targets):
    """x: (B2, 3H); w_t: (3H, N); b: (1, N); targets: (B2,) int32.
    Returns (logits (B2, N), per-row CE loss (B2, 1))."""
    B2, F = x.shape
    N = w_t.shape[1]
    tgt2d = targets.reshape(B2, 1).astype(jnp.int32)

    tile_b = _pick_tile(B2, (256, 128, 64, 32, 16, 8))
    tile_n = _pick_tile(N, (1024, 512, 256, 128))       # sized for v7x 64MiB VMEM too
    nb, nn = B2 // tile_b, N // tile_n

    cost = pl.CostEstimate(
        flops=2 * B2 * F * N + 6 * B2 * N,
        transcendentals=B2 * N,
        bytes_accessed=4 * (B2 * F + F * N + N + B2 * N + 2 * B2))

    return pl.pallas_call(
        linear_ce_kernel,
        out_shape=(jax.ShapeDtypeStruct((B2, N), jnp.float32),
                   jax.ShapeDtypeStruct((B2, 1), jnp.float32)),
        grid=(nb, nn),
        in_specs=[
            pl.BlockSpec((tile_b, 1), lambda i, j: (i, 0)),       # target ids
            pl.BlockSpec((tile_b, F), lambda i, j: (i, 0)),       # features
            pl.BlockSpec((F, tile_n), lambda i, j: (0, j)),       # W^T tile
            pl.BlockSpec((1, tile_n), lambda i, j: (0, j)),       # bias tile
        ],
        out_specs=(pl.BlockSpec((tile_b, tile_n), lambda i, j: (i, j)),
                   pl.BlockSpec((tile_b, 1), lambda i, j: (i, 0))),
        scratch_shapes=[pltpu.VMEM((tile_b, 1), jnp.float32),     # running max
                        pltpu.VMEM((tile_b, 1), jnp.float32),     # running sum
                        pltpu.VMEM((tile_b, 1), jnp.float32)],    # target logit
        compiler_params=pltpu.CompilerParams(
            dimension_semantics=("parallel", "arbitrary")),
        cost_estimate=cost,
    )(tgt2d, x, w_t, b)


# -----------------------------------------------------------------------------
# Model glue (plain JAX)
# -----------------------------------------------------------------------------
def mean_aggregate(hist_ents, hist_nb_mask, ent_sorted, r_sorted,
                   ent_embeds, rel_embeds):
    """Per history step: concat(mean neighbor embed, subject embed, rel embed)."""
    nb_emb = ent_embeds[hist_ents]                       # (B, L, NB, H)
    mask = hist_nb_mask[..., None]                       # (B, L, NB, 1)
    cnt = jnp.maximum(jnp.sum(mask, axis=2), 1.0)        # (B, L, 1)
    mean_emb = jnp.sum(nb_emb * mask, axis=2) / cnt      # (B, L, H)
    B, L, H = mean_emb.shape
    s_emb = jnp.broadcast_to(ent_embeds[ent_sorted][:, None, :], (B, L, H))
    r_emb = jnp.broadcast_to(rel_embeds[r_sorted][:, None, :], (B, L, H))
    return jnp.concatenate([mean_emb, s_emb, r_emb], axis=-1)   # (B, L, 3H)


@functools.partial(jax.jit, static_argnames=("num_rels", "in_dim"))
def renet_forward(params, triplets,
                  s_hist_ents, s_hist_mask, s_hist_len,
                  o_hist_ents, o_hist_mask, o_hist_len,
                  *, num_rels, in_dim):
    s, r, o = triplets[:, 0], triplets[:, 1], triplets[:, 2]
    B = s.shape[0]

    # sort by history length, descending -- matches torch.sort(descending=True)
    s_idx = jnp.argsort(-s_hist_len)
    o_idx = jnp.argsort(-o_hist_len)

    ent_embeds = params["ent_embeds"]
    rel_s = params["rel_embeds"][:num_rels]
    rel_o = params["rel_embeds"][num_rels:]

    s_sorted, r_s_sorted = s[s_idx], r[s_idx]
    o_sorted, r_o_sorted = o[o_idx], r[o_idx]

    # ---- history aggregation (MeanAggregator semantics) -----------------------
    s_seq = mean_aggregate(s_hist_ents[s_idx], s_hist_mask[s_idx],
                           s_sorted, r_s_sorted, ent_embeds, rel_s)
    o_seq = mean_aggregate(o_hist_ents[o_idx], o_hist_mask[o_idx],
                           o_sorted, r_o_sorted, ent_embeds, rel_o)

    # ---- one shared-weight GRU over the stacked (sub, ob) batch ---------------
    seq_all = jnp.concatenate([s_seq, o_seq], axis=0)             # (2B, L, 3H)
    len_all = jnp.concatenate([s_hist_len[s_idx], o_hist_len[o_idx]], axis=0)

    # hoisted input-path GEMM (all time steps at once): one big MXU-friendly matmul
    gru = params["gru"]
    gates_in = jnp.einsum("blf,fg->blg", seq_all, gru["w_ih"]) + gru["b_ih"]

    h_all = gru_pallas(gates_in, len_all, gru["w_hh"], gru["b_hh"])   # (2B, H)
    s_h, o_h = h_all[:B], h_all[B:]

    # ---- one shared-weight linear + cross-entropy (dropout p=0 => identity) ---
    x_sub = jnp.concatenate([ent_embeds[s_sorted], s_h, rel_s[r_s_sorted]], axis=1)
    x_ob = jnp.concatenate([ent_embeds[o_sorted], o_h, rel_o[r_o_sorted]], axis=1)
    x_all = jnp.concatenate([x_sub, x_ob], axis=0)                # (2B, 3H)
    tgt_all = jnp.concatenate([o[s_idx], s[o_idx]], axis=0)       # (2B,) int targets

    logits_all, loss_rows = linear_ce_pallas(
        x_all, params["lin_w_t"], params["lin_b"], tgt_all)

    ob_pred, sub_pred = logits_all[:B], logits_all[B:]
    loss = jnp.mean(loss_rows[:B]) + jnp.mean(loss_rows[B:])
    return loss, sub_pred, ob_pred, o_idx, s_idx


# -----------------------------------------------------------------------------
# Deterministic parameter / input construction
# -----------------------------------------------------------------------------
def xavier_uniform(key, shape, gain=1.0):
    fan_out, fan_in = shape
    a = gain * np.sqrt(6.0 / (fan_in + fan_out))
    return jax.random.uniform(key, shape, jnp.float32, -a, a)


def make_params(key, in_dim, h_dim, num_rels):
    ks = jax.random.split(key, 12)
    gain = np.sqrt(2.0)  # calculate_gain('relu')
    params = {
        "rel_embeds": xavier_uniform(ks[0], (2 * num_rels, h_dim), gain),
        "ent_embeds": xavier_uniform(ks[1], (in_dim + 1, h_dim), gain),
    }
    # GRU(3*h_dim -> h_dim), PyTorch-style uniform(-1/sqrt(h), 1/sqrt(h));
    # gate order [r | z | n], weights pre-fused along the gate axis.
    k = 1.0 / np.sqrt(h_dim)
    u = lambda kk, sh: jax.random.uniform(kk, sh, jnp.float32, -k, k)
    params["gru"] = {
        "w_ih": u(ks[2], (3 * h_dim, 3 * h_dim)),   # [W_ir | W_iz | W_in]
        "b_ih": u(ks[3], (1, 3 * h_dim)),
        "w_hh": u(ks[4], (h_dim, 3 * h_dim)),       # [W_hr | W_hz | W_hn]
        "b_hh": u(ks[5], (1, 3 * h_dim)),
    }
    # linear_sub == linear_ob : Linear(3*h_dim, in_dim)
    kl = 1.0 / np.sqrt(3 * h_dim)
    params["lin_w_t"] = jax.random.uniform(ks[6], (3 * h_dim, in_dim),
                                           jnp.float32, -kl, kl)
    params["lin_b"] = jax.random.uniform(ks[7], (1, in_dim),
                                         jnp.float32, -kl, kl)
    return params


if __name__ == "__main__":
    IN_DIM = 128      # number of entities
    H_DIM = 32
    NUM_RELS = 4
    B = 8             # batch of triplets
    SEQ_LEN = 4       # history length (model.seq_len analog, small for test)
    NB = 3            # neighbors per history step

    root = jax.random.PRNGKey(0)
    kp, kt, k1, k2, k3, k4 = jax.random.split(root, 6)

    params = make_params(kp, IN_DIM, H_DIM, NUM_RELS)

    triplets = jnp.stack([
        jax.random.randint(kt, (B,), 0, IN_DIM),
        jax.random.randint(k1, (B,), 0, NUM_RELS),
        jax.random.randint(k2, (B,), 0, IN_DIM),
    ], axis=1).astype(jnp.int32)

    def make_hist(key):
        ka, kb, kc = jax.random.split(key, 3)
        lens = jax.random.randint(ka, (B,), 0, SEQ_LEN + 1).astype(jnp.int32)
        ents = jax.random.randint(kb, (B, SEQ_LEN, NB), 0, IN_DIM).astype(jnp.int32)
        nb_cnt = jax.random.randint(kc, (B, SEQ_LEN), 1, NB + 1)
        nb_mask = (jnp.arange(NB)[None, None, :] < nb_cnt[..., None]).astype(jnp.float32)
        return ents, nb_mask, lens

    s_hist_ents, s_hist_mask, s_hist_len = make_hist(k3)
    o_hist_ents, o_hist_mask, o_hist_len = make_hist(k4)

    loss, sub_pred, ob_pred, o_idx, s_idx = renet_forward(
        params, triplets,
        s_hist_ents, s_hist_mask, s_hist_len,
        o_hist_ents, o_hist_mask, o_hist_len,
        num_rels=NUM_RELS, in_dim=IN_DIM)

    jax.block_until_ready((loss, sub_pred, ob_pred, o_idx, s_idx))
    assert sub_pred.shape == (B, IN_DIM) and ob_pred.shape == (B, IN_DIM)
    assert jnp.isfinite(loss)
    print("KERNEL_OK")
</pallas_src>

<mosaic_0001>
module attributes {stable_mosaic.version = 11 : i64} {
  func.func @gru_kernel(%arg0: i32, %arg1: memref<16x1xi32, #tpu.memory_space<vmem>>, %arg2: memref<4x16x96xf32, #tpu.memory_space<vmem>>, %arg3: memref<32x96xf32, #tpu.memory_space<vmem>>, %arg4: memref<1x96xf32, #tpu.memory_space<vmem>>, %arg5: memref<16x32xf32, #tpu.memory_space<vmem>>) attributes {dimension_semantics = [#tpu.dimension_semantics<parallel>], iteration_bounds = array<i64: 1>, scalar_prefetch = 0 : i64, scratch_operands = 0 : i64, tpu.core_type = #tpu.core_type<tc>, window_params = [{transform_indices = @transform_0, window_bounds = array<i64: 16, 1>}, {transform_indices = @transform_1, window_bounds = array<i64: 4, 16, 96>}, {pipeline_mode = #tpu.pipeline_mode<synchronous>, transform_indices = @transform_2, window_bounds = array<i64: 32, 96>}, {pipeline_mode = #tpu.pipeline_mode<synchronous>, transform_indices = @transform_3, window_bounds = array<i64: 1, 96>}, {transform_indices = @transform_4, window_bounds = array<i64: 16, 32>}]} {
    %c0 = arith.constant 0 : index
    %c0_0 = arith.constant 0 : index
    %0 = vector.load %arg3[%c0, %c0_0] : memref<32x96xf32, #tpu.memory_space<vmem>>, vector<32x96xf32>
    %c0_1 = arith.constant 0 : index
    %c0_2 = arith.constant 0 : index
    %1 = vector.load %arg4[%c0_1, %c0_2] : memref<1x96xf32, #tpu.memory_space<vmem>>, vector<1x96xf32>
    %c0_3 = arith.constant 0 : index
    %c0_4 = arith.constant 0 : index
    %2 = vector.load %arg1[%c0_3, %c0_4] : memref<16x1xi32, #tpu.memory_space<vmem>>, vector<16x1xi32>
    %cst = arith.constant 0.000000e+00 : f32
    %3 = vector.broadcast %cst : f32 to vector<16x32xf32>
    %c0_i32 = arith.constant 0 : i32
    %4 = arith.index_cast %c0_i32 : i32 to index
    %c0_5 = arith.constant 0 : index
    %c0_6 = arith.constant 0 : index
    %5 = vector.load %arg2[%4, %c0_5, %c0_6] : memref<4x16x96xf32, #tpu.memory_space<vmem>>, vector<1x16x96xf32>
    %6 = vector.shape_cast %5 : vector<1x16x96xf32> to vector<16x96xf32>
    %cst_7 = arith.constant dense<0.000000e+00> : vector<16x96xf32>
    %7 = tpu.matmul %3, %0, %cst_7 {dimension_numbers = #tpu.dot_dimension_numbers<[1], [0], [0], [1], [0, 0, 1, 1], [], []>} : vector<16x32xf32>, vector<32x96xf32>, vector<16x96xf32> -> vector<16x96xf32>
    %8 = vector.broadcast %1 : vector<1x96xf32> to vector<16x96xf32>
    %9 = arith.addf %7, %8 : vector<16x96xf32>
    %10 = vector.extract_strided_slice %6 {offsets = [0, 0], sizes = [16, 32], strides = [1, 1]} : vector<16x96xf32> to vector<16x32xf32>
    %11 = vector.extract_strided_slice %9 {offsets = [0, 0], sizes = [16, 32], strides = [1, 1]} : vector<16x96xf32> to vector<16x32xf32>
    %12 = arith.addf %10, %11 : vector<16x32xf32>
    %13 = arith.negf %12 : vector<16x32xf32>
    %14 = math.exp %13 : vector<16x32xf32>
    %cst_8 = arith.constant 1.000000e+00 : f32
    %15 = vector.broadcast %cst_8 : f32 to vector<16x32xf32>
    %16 = arith.addf %15, %14 : vector<16x32xf32>
    %17 = arith.divf %15, %16 : vector<16x32xf32>
    %18 = vector.extract_strided_slice %6 {offsets = [0, 32], sizes = [16, 32], strides = [1, 1]} : vector<16x96xf32> to vector<16x32xf32>
    %19 = vector.extract_strided_slice %9 {offsets = [0, 32], sizes = [16, 32], strides = [1, 1]} : vector<16x96xf32> to vector<16x32xf32>
    %20 = arith.addf %18, %19 : vector<16x32xf32>
    %21 = arith.negf %20 : vector<16x32xf32>
    %22 = math.exp %21 : vector<16x32xf32>
    %cst_9 = arith.constant 1.000000e+00 : f32
    %23 = vector.broadcast %cst_9 : f32 to vector<16x32xf32>
    %24 = arith.addf %23, %22 : vector<16x32xf32>
    %25 = arith.divf %23, %24 : vector<16x32xf32>
    %26 = vector.extract_strided_slice %6 {offsets = [0, 64], sizes = [16, 32], strides = [1, 1]} : vector<16x96xf32> to vector<16x32xf32>
    %27 = vector.extract_strided_slice %9 {offsets = [0, 64], sizes = [16, 32], strides = [1, 1]} : vector<16x96xf32> to vector<16x32xf32>
    %28 = arith.mulf %17, %27 : vector<16x32xf32>
    %29 = arith.addf %26, %28 : vector<16x32xf32>
    %30 = math.tanh %29 : vector<16x32xf32>
    %cst_10 = arith.constant 1.000000e+00 : f32
    %31 = vector.broadcast %cst_10 : f32 to vector<16x32xf32>
    %32 = arith.subf %31, %25 : vector<16x32xf32>
    %33 = arith.mulf %32, %30 : vector<16x32xf32>
    %34 = arith.mulf %25, %3 : vector<16x32xf32>
    %35 = arith.addf %33, %34 : vector<16x32xf32>
    %36 = vector.broadcast %c0_i32 : i32 to vector<16x1xi32>
    %37 = arith.cmpi slt, %36, %2 : vector<16x1xi32>
    %38 = vector.shape_cast %37 : vector<16x1xi1> to vector<16x1xi1>
    %39 = vector.broadcast %38 : vector<16x1xi1> to vector<16x32xi1>
    %40 = arith.select %39, %35, %3 : vector<16x32xi1>, vector<16x32xf32>
    %c1_i32 = arith.constant 1 : i32
    %41 = arith.index_cast %c1_i32 : i32 to index
    %c0_11 = arith.constant 0 : index
    %c0_12 = arith.constant 0 : index
    %42 = vector.load %arg2[%41, %c0_11, %c0_12] : memref<4x16x96xf32, #tpu.memory_space<vmem>>, vector<1x16x96xf32>
    %43 = vector.shape_cast %42 : vector<1x16x96xf32> to vector<16x96xf32>
    %cst_13 = arith.constant dense<0.000000e+00> : vector<16x96xf32>
    %44 = tpu.matmul %40, %0, %cst_13 {dimension_numbers = #tpu.dot_dimension_numbers<[1], [0], [0], [1], [0, 0, 1, 1], [], []>} : vector<16x32xf32>, vector<32x96xf32>, vector<16x96xf32> -> vector<16x96xf32>
    %45 = vector.broadcast %1 : vector<1x96xf32> to vector<16x96xf32>
    %46 = arith.addf %44, %45 : vector<16x96xf32>
    %47 = vector.extract_strided_slice %43 {offsets = [0, 0], sizes = [16, 32], strides = [1, 1]} : vector<16x96xf32> to vector<16x32xf32>
    %48 = vector.extract_strided_slice %46 {offsets = [0, 0], sizes = [16, 32], strides = [1, 1]} : vector<16x96xf32> to vector<16x32xf32>
    %49 = arith.addf %47, %48 : vector<16x32xf32>
    %50 = arith.negf %49 : vector<16x32xf32>
    %51 = math.exp %50 : vector<16x32xf32>
    %cst_14 = arith.constant 1.000000e+00 : f32
    %52 = vector.broadcast %cst_14 : f32 to vector<16x32xf32>
    %53 = arith.addf %52, %51 : vector<16x32xf32>
    %54 = arith.divf %52, %53 : vector<16x32xf32>
    %55 = vector.extract_strided_slice %43 {offsets = [0, 32], sizes = [16, 32], strides = [1, 1]} : vector<16x96xf32> to vector<16x32xf32>
    %56 = vector.extract_strided_slice %46 {offsets = [0, 32], sizes = [16, 32], strides = [1, 1]} : vector<16x96xf32> to vector<16x32xf32>
    %57 = arith.addf %55, %56 : vector<16x32xf32>
    %58 = arith.negf %57 : vector<16x32xf32>
    %59 = math.exp %58 : vector<16x32xf32>
    %cst_15 = arith.constant 1.000000e+00 : f32
    %60 = vector.broadcast %cst_15 : f32 to vector<16x32xf32>
    %61 = arith.addf %60, %59 : vector<16x32xf32>
    %62 = arith.divf %60, %61 : vector<16x32xf32>
    %63 = vector.extract_strided_slice %43 {offsets = [0, 64], sizes = [16, 32], strides = [1, 1]} : vector<16x96xf32> to vector<16x32xf32>
    %64 = vector.extract_strided_slice %46 {offsets = [0, 64], sizes = [16, 32], strides = [1, 1]} : vector<16x96xf32> to vector<16x32xf32>
    %65 = arith.mulf %54, %64 : vector<16x32xf32>
    %66 = arith.addf %63, %65 : vector<16x32xf32>
    %67 = math.tanh %66 : vector<16x32xf32>
    %cst_16 = arith.constant 1.000000e+00 : f32
    %68 = vector.broadcast %cst_16 : f32 to vector<16x32xf32>
    %69 = arith.subf %68, %62 : vector<16x32xf32>
    %70 = arith.mulf %69, %67 : vector<16x32xf32>
    %71 = arith.mulf %62, %40 : vector<16x32xf32>
    %72 = arith.addf %70, %71 : vector<16x32xf32>
    %73 = vector.broadcast %c1_i32 : i32 to vector<16x1xi32>
    %74 = arith.cmpi slt, %73, %2 : vector<16x1xi32>
    %75 = vector.shape_cast %74 : vector<16x1xi1> to vector<16x1xi1>
    %76 = vector.broadcast %75 : vector<16x1xi1> to vector<16x32xi1>
    %77 = arith.select %76, %72, %40 : vector<16x32xi1>, vector<16x32xf32>
    %c2_i32 = arith.constant 2 : i32
    %78 = arith.index_cast %c2_i32 : i32 to index
    %c0_17 = arith.constant 0 : index
    %c0_18 = arith.constant 0 : index
    %79 = vector.load %arg2[%78, %c0_17, %c0_18] : memref<4x16x96xf32, #tpu.memory_space<vmem>>, vector<1x16x96xf32>
    %80 = vector.shape_cast %79 : vector<1x16x96xf32> to vector<16x96xf32>
    %cst_19 = arith.constant dense<0.000000e+00> : vector<16x96xf32>
    %81 = tpu.matmul %77, %0, %cst_19 {dimension_numbers = #tpu.dot_dimension_numbers<[1], [0], [0], [1], [0, 0, 1, 1], [], []>} : vector<16x32xf32>, vector<32x96xf32>, vector<16x96xf32> -> vector<16x96xf32>
    %82 = vector.broadcast %1 : vector<1x96xf32> to vector<16x96xf32>
    %83 = arith.addf %81, %82 : vector<16x96xf32>
    %84 = vector.extract_strided_slice %80 {offsets = [0, 0], sizes = [16, 32], strides = [1, 1]} : vector<16x96xf32> to vector<16x32xf32>
    %85 = vector.extract_strided_slice %83 {offsets = [0, 0], sizes = [16, 32], strides = [1, 1]} : vector<16x96xf32> to vector<16x32xf32>
    %86 = arith.addf %84, %85 : vector<16x32xf32>
    %87 = arith.negf %86 : vector<16x32xf32>
    %88 = math.exp %87 : vector<16x32xf32>
    %cst_20 = arith.constant 1.000000e+00 : f32
    %89 = vector.broadcast %cst_20 : f32 to vector<16x32xf32>
    %90 = arith.addf %89, %88 : vector<16x32xf32>
    %91 = arith.divf %89, %90 : vector<16x32xf32>
    %92 = vector.extract_strided_slice %80 {offsets = [0, 32], sizes = [16, 32], strides = [1, 1]} : vector<16x96xf32> to vector<16x32xf32>
    %93 = vector.extract_strided_slice %83 {offsets = [0, 32], sizes = [16, 32], strides = [1, 1]} : vector<16x96xf32> to vector<16x32xf32>
    %94 = arith.addf %92, %93 : vector<16x32xf32>
    %95 = arith.negf %94 : vector<16x32xf32>
    %96 = math.exp %95 : vector<16x32xf32>
    %cst_21 = arith.constant 1.000000e+00 : f32
    %97 = vector.broadcast %cst_21 : f32 to vector<16x32xf32>
    %98 = arith.addf %97, %96 : vector<16x32xf32>
    %99 = arith.divf %97, %98 : vector<16x32xf32>
    %100 = vector.extract_strided_slice %80 {offsets = [0, 64], sizes = [16, 32], strides = [1, 1]} : vector<16x96xf32> to vector<16x32xf32>
    %101 = vector.extract_strided_slice %83 {offsets = [0, 64], sizes = [16, 32], strides = [1, 1]} : vector<16x96xf32> to vector<16x32xf32>
    %102 = arith.mulf %91, %101 : vector<16x32xf32>
    %103 = arith.addf %100, %102 : vector<16x32xf32>
    %104 = math.tanh %103 : vector<16x32xf32>
    %cst_22 = arith.constant 1.000000e+00 : f32
    %105 = vector.broadcast %cst_22 : f32 to vector<16x32xf32>
    %106 = arith.subf %105, %99 : vector<16x32xf32>
    %107 = arith.mulf %106, %104 : vector<16x32xf32>
    %108 = arith.mulf %99, %77 : vector<16x32xf32>
    %109 = arith.addf %107, %108 : vector<16x32xf32>
    %110 = vector.broadcast %c2_i32 : i32 to vector<16x1xi32>
    %111 = arith.cmpi slt, %110, %2 : vector<16x1xi32>
    %112 = vector.shape_cast %111 : vector<16x1xi1> to vector<16x1xi1>
    %113 = vector.broadcast %112 : vector<16x1xi1> to vector<16x32xi1>
    %114 = arith.select %113, %109, %77 : vector<16x32xi1>, vector<16x32xf32>
    %c3_i32 = arith.constant 3 : i32
    %115 = arith.index_cast %c3_i32 : i32 to index
    %c0_23 = arith.constant 0 : index
    %c0_24 = arith.constant 0 : index
    %116 = vector.load %arg2[%115, %c0_23, %c0_24] : memref<4x16x96xf32, #tpu.memory_space<vmem>>, vector<1x16x96xf32>
    %117 = vector.shape_cast %116 : vector<1x16x96xf32> to vector<16x96xf32>
    %cst_25 = arith.constant dense<0.000000e+00> : vector<16x96xf32>
    %118 = tpu.matmul %114, %0, %cst_25 {dimension_numbers = #tpu.dot_dimension_numbers<[1], [0], [0], [1], [0, 0, 1, 1], [], []>} : vector<16x32xf32>, vector<32x96xf32>, vector<16x96xf32> -> vector<16x96xf32>
    %119 = vector.broadcast %1 : vector<1x96xf32> to vector<16x96xf32>
    %120 = arith.addf %118, %119 : vector<16x96xf32>
    %121 = vector.extract_strided_slice %117 {offsets = [0, 0], sizes = [16, 32], strides = [1, 1]} : vector<16x96xf32> to vector<16x32xf32>
    %122 = vector.extract_strided_slice %120 {offsets = [0, 0], sizes = [16, 32], strides = [1, 1]} : vector<16x96xf32> to vector<16x32xf32>
    %123 = arith.addf %121, %122 : vector<16x32xf32>
    %124 = arith.negf %123 : vector<16x32xf32>
    %125 = math.exp %124 : vector<16x32xf32>
    %cst_26 = arith.constant 1.000000e+00 : f32
    %126 = vector.broadcast %cst_26 : f32 to vector<16x32xf32>
    %127 = arith.addf %126, %125 : vector<16x32xf32>
    %128 = arith.divf %126, %127 : vector<16x32xf32>
    %129 = vector.extract_strided_slice %117 {offsets = [0, 32], sizes = [16, 32], strides = [1, 1]} : vector<16x96xf32> to vector<16x32xf32>
    %130 = vector.extract_strided_slice %120 {offsets = [0, 32], sizes = [16, 32], strides = [1, 1]} : vector<16x96xf32> to vector<16x32xf32>
    %131 = arith.addf %129, %130 : vector<16x32xf32>
    %132 = arith.negf %131 : vector<16x32xf32>
    %133 = math.exp %132 : vector<16x32xf32>
    %cst_27 = arith.constant 1.000000e+00 : f32
    %134 = vector.broadcast %cst_27 : f32 to vector<16x32xf32>
    %135 = arith.addf %134, %133 : vector<16x32xf32>
    %136 = arith.divf %134, %135 : vector<16x32xf32>
    %137 = vector.extract_strided_slice %117 {offsets = [0, 64], sizes = [16, 32], strides = [1, 1]} : vector<16x96xf32> to vector<16x32xf32>
    %138 = vector.extract_strided_slice %120 {offsets = [0, 64], sizes = [16, 32], strides = [1, 1]} : vector<16x96xf32> to vector<16x32xf32>
    %139 = arith.mulf %128, %138 : vector<16x32xf32>
    %140 = arith.addf %137, %139 : vector<16x32xf32>
    %141 = math.tanh %140 : vector<16x32xf32>
    %cst_28 = arith.constant 1.000000e+00 : f32
    %142 = vector.broadcast %cst_28 : f32 to vector<16x32xf32>
    %143 = arith.subf %142, %136 : vector<16x32xf32>
    %144 = arith.mulf %143, %141 : vector<16x32xf32>
    %145 = arith.mulf %136, %114 : vector<16x32xf32>
    %146 = arith.addf %144, %145 : vector<16x32xf32>
    %147 = vector.broadcast %c3_i32 : i32 to vector<16x1xi32>
    %148 = arith.cmpi slt, %147, %2 : vector<16x1xi32>
    %149 = vector.shape_cast %148 : vector<16x1xi1> to vector<16x1xi1>
    %150 = vector.broadcast %149 : vector<16x1xi1> to vector<16x32xi1>
    %151 = arith.select %150, %146, %114 : vector<16x32xi1>, vector<16x32xf32>
    %c4_i32 = arith.constant 4 : i32
    %c0_29 = arith.constant 0 : index
    %c0_30 = arith.constant 0 : index
    %152 = vector.load %arg5[%c0_29, %c0_30] : memref<16x32xf32, #tpu.memory_space<vmem>>, vector<16x32xf32>
    tpu.vector_store %arg5[%c0_29, %c0_30], %151 {strides = array<i32>} : memref<16x32xf32, #tpu.memory_space<vmem>>, vector<16x32xf32>,
    return
  }
  func.func @transform_0(%arg0: i32) -> (i32, i32) {
    %c0_i32 = arith.constant 0 : i32
    %c0_i32_0 = arith.constant 0 : i32
    return %arg0, %c0_i32 : i32, i32
  }
  func.func @transform_1(%arg0: i32) -> (i32, i32, i32) {
    %c0_i32 = arith.constant 0 : i32
    %c0_i32_0 = arith.constant 0 : i32
    %c0_i32_1 = arith.constant 0 : i32
    return %c0_i32, %arg0, %c0_i32_0 : i32, i32, i32
  }
  func.func @transform_2(%arg0: i32) -> (i32, i32) {
    %c0_i32 = arith.constant 0 : i32
    %c0_i32_0 = arith.constant 0 : i32
    %c0_i32_1 = arith.constant 0 : i32
    return %c0_i32, %c0_i32_0 : i32, i32
  }
  func.func @transform_3(%arg0: i32) -> (i32, i32) {
    %c0_i32 = arith.constant 0 : i32
    %c0_i32_0 = arith.constant 0 : i32
    %c0_i32_1 = arith.constant 0 : i32
    return %c0_i32, %c0_i32_0 : i32, i32
  }
  func.func @transform_4(%arg0: i32) -> (i32, i32) {
    %c0_i32 = arith.constant 0 : i32
    %c0_i32_0 = arith.constant 0 : i32
    return %arg0, %c0_i32 : i32, i32
  }
}

module attributes {stable_mosaic.version = 11 : i64} {
  func.func @linear_ce_kernel(%arg0: i32, %arg1: i32, %arg2: memref<16x1xi32, #tpu.memory_space<vmem>>, %arg3: memref<16x96xf32, #tpu.memory_space<vmem>>, %arg4: memref<96x128xf32, #tpu.memory_space<vmem>>, %arg5: memref<1x128xf32, #tpu.memory_space<vmem>>, %arg6: memref<16x128xf32, #tpu.memory_space<vmem>>, %arg7: memref<16x1xf32, #tpu.memory_space<vmem>>, %arg8: memref<16x1xf32, #tpu.memory_space<vmem>>, %arg9: memref<16x1xf32, #tpu.memory_space<vmem>>, %arg10: memref<16x1xf32, #tpu.memory_space<vmem>>) attributes {dimension_semantics = [#tpu.dimension_semantics<parallel>, #tpu.dimension_semantics<arbitrary>], iteration_bounds = array<i64: 1, 1>, scalar_prefetch = 0 : i64, scratch_operands = 3 : i64, tpu.core_type = #tpu.core_type<tc>, window_params = [{transform_indices = @transform_0, window_bounds = array<i64: 16, 1>}, {transform_indices = @transform_1, window_bounds = array<i64: 16, 96>}, {transform_indices = @transform_2, window_bounds = array<i64: 96, 128>}, {transform_indices = @transform_3, window_bounds = array<i64: 1, 128>}, {transform_indices = @transform_4, window_bounds = array<i64: 16, 128>}, {transform_indices = @transform_5, window_bounds = array<i64: 16, 1>}]} {
    %c0_i32 = arith.constant 0 : i32
    %0 = arith.cmpi eq, %arg1, %c0_i32 : i32
    %1 = arith.extui %0 : i1 to i32
    %c0_i32_0 = arith.constant 0 : i32
    %2 = arith.cmpi ne, %1, %c0_i32_0 : i32
    scf.if %2 {
      %cst_28 = arith.constant 0xFF800000 : f32
      %43 = vector.broadcast %cst_28 : f32 to vector<16x1xf32>
      %c0_29 = arith.constant 0 : index
      %c0_30 = arith.constant 0 : index
      %44 = vector.load %arg8[%c0_29, %c0_30] : memref<16x1xf32, #tpu.memory_space<vmem>>, vector<16x1xf32>
      tpu.vector_store %arg8[%c0_29, %c0_30], %43 {strides = array<i32>} : memref<16x1xf32, #tpu.memory_space<vmem>>, vector<16x1xf32>,
      %cst_31 = arith.constant 0.000000e+00 : f32
      %45 = vector.broadcast %cst_31 : f32 to vector<16x1xf32>
      %c0_32 = arith.constant 0 : index
      %c0_33 = arith.constant 0 : index
      %46 = vector.load %arg9[%c0_32, %c0_33] : memref<16x1xf32, #tpu.memory_space<vmem>>, vector<16x1xf32>
      tpu.vector_store %arg9[%c0_32, %c0_33], %45 {strides = array<i32>} : memref<16x1xf32, #tpu.memory_space<vmem>>, vector<16x1xf32>,
      %cst_34 = arith.constant 0.000000e+00 : f32
      %47 = vector.broadcast %cst_34 : f32 to vector<16x1xf32>
      %c0_35 = arith.constant 0 : index
      %c0_36 = arith.constant 0 : index
      %48 = vector.load %arg10[%c0_35, %c0_36] : memref<16x1xf32, #tpu.memory_space<vmem>>, vector<16x1xf32>
      tpu.vector_store %arg10[%c0_35, %c0_36], %47 {strides = array<i32>} : memref<16x1xf32, #tpu.memory_space<vmem>>, vector<16x1xf32>,
    } else {
    }
    %c0 = arith.constant 0 : index
    %c0_1 = arith.constant 0 : index
    %3 = vector.load %arg3[%c0, %c0_1] : memref<16x96xf32, #tpu.memory_space<vmem>>, vector<16x96xf32>
    %c0_2 = arith.constant 0 : index
    %c0_3 = arith.constant 0 : index
    %4 = vector.load %arg4[%c0_2, %c0_3] : memref<96x128xf32, #tpu.memory_space<vmem>>, vector<96x128xf32>
    %cst = arith.constant dense<0.000000e+00> : vector<16x128xf32>
    %5 = tpu.matmul %3, %4, %cst {dimension_numbers = #tpu.dot_dimension_numbers<[1], [0], [0], [1], [0, 0, 1, 1], [], []>} : vector<16x96xf32>, vector<96x128xf32>, vector<16x128xf32> -> vector<16x128xf32>
    %c0_4 = arith.constant 0 : index
    %c0_5 = arith.constant 0 : index
    %6 = vector.load %arg5[%c0_4, %c0_5] : memref<1x128xf32, #tpu.memory_space<vmem>>, vector<1x128xf32>
    %7 = vector.broadcast %6 : vector<1x128xf32> to vector<16x128xf32>
    %8 = arith.addf %5, %7 : vector<16x128xf32>
    %c0_6 = arith.constant 0 : index
    %c0_7 = arith.constant 0 : index
    %9 = vector.load %arg6[%c0_6, %c0_7] : memref<16x128xf32, #tpu.memory_space<vmem>>, vector<16x128xf32>
    tpu.vector_store %arg6[%c0_6, %c0_7], %8 {strides = array<i32>} : memref<16x128xf32, #tpu.memory_space<vmem>>, vector<16x128xf32>,
    %c128_i32 = arith.constant 128 : i32
    %10 = arith.muli %arg1, %c128_i32 : i32
    %11 = tpu.iota {dimensions = array<i32: 1>} : vector<16x128xi32>
    %12 = vector.broadcast %10 : i32 to vector<16x128xi32>
    %13 = arith.addi %12, %11 : vector<16x128xi32>
    %c0_8 = arith.constant 0 : index
    %c0_9 = arith.constant 0 : index
    %14 = vector.load %arg2[%c0_8, %c0_9] : memref<16x1xi32, #tpu.memory_space<vmem>>, vector<16x1xi32>
    %15 = vector.broadcast %14 : vector<16x1xi32> to vector<16x128xi32>
    %16 = arith.cmpi eq, %13, %15 : vector<16x128xi32>
    %c0_10 = arith.constant 0 : index
    %c0_11 = arith.constant 0 : index
    %17 = vector.load %arg10[%c0_10, %c0_11] : memref<16x1xf32, #tpu.memory_space<vmem>>, vector<16x1xf32>
    %cst_12 = arith.constant 0.000000e+00 : f32
    %18 = vector.broadcast %cst_12 : f32 to vector<16x128xf32>
    %19 = arith.select %16, %8, %18 : vector<16x128xi1>, vector<16x128xf32>
    %cst_13 = arith.constant dense<0.000000e+00> : vector<16xf32>
    %20 = vector.multi_reduction <add>, %19, %cst_13 [1] : vector<16x128xf32> to vector<16xf32>
    %21 = vector.shape_cast %20 : vector<16xf32> to vector<16x1xf32>
    %22 = arith.addf %17, %21 : vector<16x1xf32>
    %c0_14 = arith.constant 0 : index
    %c0_15 = arith.constant 0 : index
    %23 = vector.load %arg10[%c0_14, %c0_15] : memref<16x1xf32, #tpu.memory_space<vmem>>, vector<16x1xf32>
    tpu.vector_store %arg10[%c0_14, %c0_15], %22 {strides = array<i32>} : memref<16x1xf32, #tpu.memory_space<vmem>>, vector<16x1xf32>,
    %c0_16 = arith.constant 0 : index
    %c0_17 = arith.constant 0 : index
    %24 = vector.load %arg8[%c0_16, %c0_17] : memref<16x1xf32, #tpu.memory_space<vmem>>, vector<16x1xf32>
    %cst_18 = arith.constant dense<0xFF800000> : vector<16xf32>
    %25 = vector.multi_reduction <maximumf>, %8, %cst_18 [1] : vector<16x128xf32> to vector<16xf32>
    %26 = vector.shape_cast %25 : vector<16xf32> to vector<16x1xf32>
    %27 = arith.maximumf %24, %26 : vector<16x1xf32>
    %c0_19 = arith.constant 0 : index
    %c0_20 = arith.constant 0 : index
    %28 = vector.load %arg9[%c0_19, %c0_20] : memref<16x1xf32, #tpu.memory_space<vmem>>, vector<16x1xf32>
    %29 = arith.subf %24, %27 : vector<16x1xf32>
    %30 = math.exp %29 : vector<16x1xf32>
    %31 = arith.mulf %28, %30 : vector<16x1xf32>
    %32 = vector.broadcast %27 : vector<16x1xf32> to vector<16x128xf32>
    %33 = arith.subf %8, %32 : vector<16x128xf32>
    %34 = math.exp %33 : vector<16x128xf32>
    %cst_21 = arith.constant dense<0.000000e+00> : vector<16xf32>
    %35 = vector.multi_reduction <add>, %34, %cst_21 [1] : vector<16x128xf32> to vector<16xf32>
    %36 = vector.shape_cast %35 : vector<16xf32> to vector<16x1xf32>
    %37 = arith.addf %31, %36 : vector<16x1xf32>
    %c0_22 = arith.constant 0 : index
    %c0_23 = arith.constant 0 : index
    %38 = vector.load %arg9[%c0_22, %c0_23] : memref<16x1xf32, #tpu.memory_space<vmem>>, vector<16x1xf32>
    tpu.vector_store %arg9[%c0_22, %c0_23], %37 {strides = array<i32>} : memref<16x1xf32, #tpu.memory_space<vmem>>, vector<16x1xf32>,
    %c0_24 = arith.constant 0 : index
    %c0_25 = arith.constant 0 : index
    %39 = vector.load %arg8[%c0_24, %c0_25] : memref<16x1xf32, #tpu.memory_space<vmem>>, vector<16x1xf32>
    tpu.vector_store %arg8[%c0_24, %c0_25], %27 {strides = array<i32>} : memref<16x1xf32, #tpu.memory_space<vmem>>, vector<16x1xf32>,
    %c0_i32_26 = arith.constant 0 : i32
    %40 = arith.cmpi eq, %arg1, %c0_i32_26 : i32
    %41 = arith.extui %40 : i1 to i32
    %c0_i32_27 = arith.constant 0 : i32
    %42 = arith.cmpi ne, %41, %c0_i32_27 : i32
    scf.if %42 {
      %c0_28 = arith.constant 0 : index
      %c0_29 = arith.constant 0 : index
      %43 = vector.load %arg8[%c0_28, %c0_29] : memref<16x1xf32, #tpu.memory_space<vmem>>, vector<16x1xf32>
      %c0_30 = arith.constant 0 : index
      %c0_31 = arith.constant 0 : index
      %44 = vector.load %arg9[%c0_30, %c0_31] : memref<16x1xf32, #tpu.memory_space<vmem>>, vector<16x1xf32>
      %45 = math.log %44 : vector<16x1xf32>
      %46 = arith.addf %43, %45 : vector<16x1xf32>
      %c0_32 = arith.constant 0 : index
      %c0_33 = arith.constant 0 : index
      %47 = vector.load %arg10[%c0_32, %c0_33] : memref<16x1xf32, #tpu.memory_space<vmem>>, vector<16x1xf32>
      %48 = arith.subf %46, %47 : vector<16x1xf32>
      %c0_34 = arith.constant 0 : index
      %c0_35 = arith.constant 0 : index
      %49 = vector.load %arg7[%c0_34, %c0_35] : memref<16x1xf32, #tpu.memory_space<vmem>>, vector<16x1xf32>
      tpu.vector_store %arg7[%c0_34, %c0_35], %48 {strides = array<i32>} : memref<16x1xf32, #tpu.memory_space<vmem>>, vector<16x1xf32>,
    } else {
    }
    return
  }
  func.func @transform_0(%arg0: i32, %arg1: i32) -> (i32, i32) {
    %c0_i32 = arith.constant 0 : i32
    %c0_i32_0 = arith.constant 0 : i32
    return %arg0, %c0_i32 : i32, i32
  }
  func.func @transform_1(%arg0: i32, %arg1: i32) -> (i32, i32) {
    %c0_i32 = arith.constant 0 : i32
    %c0_i32_0 = arith.constant 0 : i32
    return %arg0, %c0_i32 : i32, i32
  }
  func.func @transform_2(%arg0: i32, %arg1: i32) -> (i32, i32) {
    %c0_i32 = arith.constant 0 : i32
    %c0_i32_0 = arith.constant 0 : i32
    return %c0_i32, %arg1 : i32, i32
  }
  func.func @transform_3(%arg0: i32, %arg1: i32) -> (i32, i32) {
    %c0_i32 = arith.constant 0 : i32
    %c0_i32_0 = arith.constant 0 : i32
    return %c0_i32, %arg1 : i32, i32
  }
  func.func @transform_4(%arg0: i32, %arg1: i32) -> (i32, i32) {
    %c0_i32 = arith.constant 0 : i32
    return %arg0, %arg1 : i32, i32
  }
  func.func @transform_5(%arg0: i32, %arg1: i32) -> (i32, i32) {
    %c0_i32 = arith.constant 0 : i32
    %c0_i32_0 = arith.constant 0 : i32
    return %arg0, %c0_i32 : i32, i32
  }
}

</mosaic_0001>

<bundles_post_ra>
// kernel: neg.3
= control target key start
LH: loop header
LB: loop body
LE: loop exit
PB: predicated region body
PF: predicated region fallthrough
CT: control target
= control target key end

     0   :  { %s24_s0 = inlined_call_operand.vmem [shape: s32[8], index: 0, kind: input, shape index: {}]   ;;  %s25_s1 = inlined_call_operand.vmem [shape: s32[8], index: 1, kind: output, shape index: {}]  }
   0x1   :  { %v2_v0 = vld [vmem:[%s24_s0] sm:$0x1] }
   0x2   :  { %v5_v1 = vsub.s32 0, %v2_v0 }
   0x4   :  { %7 = vst [vmem:[%s25_s1] sm:$0x1] %v5_v1 }

// kernel: renet_forward.3
= control target key start
LH: loop header
LB: loop body
LE: loop exit
PB: predicated region body
PF: predicated region fallthrough
CT: control target
= control target key end

     0   :  { %vm51_vm0 = vcmask 785408   ;;  %v319_v20 = vmov 0   ;;  %vm23_vm1 = vcmask 7168   ;;  %v320_v21 = vmov -inf   ;;  %s431_s2 = inlined_call_operand.vmem [shape: f32[96,128], index: 2, kind: input, shape index: {}]   ;;  %s432_s1 = inlined_call_operand.vmem [shape: f32[16,96], index: 1, kind: input, shape index: {}]   ;;  %s433_s3 = inlined_call_operand.vmem [shape: f32[1,128], index: 3, kind: input, shape index: {}]   ;;  %s434_s4 = inlined_call_operand.vmem [shape: f32[16,128], index: 4, kind: output, shape index: {0}]   ;;  %s435_s0 = inlined_call_operand.vmem [shape: s32[16,1], index: 0, kind: input, shape index: {}]   ;;  %s436_s5 = inlined_call_operand.vmem [shape: f32[16,1], index: 5, kind: output, shape index: {1}]  }
   0x1   :  { %v32_v0 = vld [vmem:[%s431_s2] sm:$0xff]  ;;  %v33_v1 = vld [vmem:[%s431_s2 + $0x8] sm:$0xff]  ;;  %v34_v2 = vld [vmem:[%s431_s2 + $0x10] sm:$0xff]  ;;  %306 = vset.pattern.permute.xlu0 %v319_v20  ;;  %305 = vset.pattern.permute.xlu1 %v319_v20  ;;  %24 = vst.msk [vmem:[#allocation2] sm:$0xff] %vm23_vm1, %v320_v21  ;;  %v321_v28 = vmov 0.0   ;;  %v136_v36 = vlaneseq }
   0x2   :  { %v278_v3 = vpack.c.bf16 %v33_v1, %v32_v0  ;;  %v35_v4 = vld [vmem:[%s431_s2 + $0x18] sm:$0xff]  ;;  %v36_v6 = vld [vmem:[%s431_s2 + $0x20] sm:$0xff]  ;;  %v37_v7 = vld [vmem:[%s431_s2 + $0x28] sm:$0xff]  ;;  %25 = vst.msk [vmem:[#allocation2 + $0x8] sm:$0xff] %vm23_vm1, %v320_v21 }
   0x3   :  { %v282_v5 = vpack.c.bf16 %v35_v4, %v34_v2  ;;  %v30_v8 = vld [vmem:[%s432_s1] sm:$0xff]  ;;  %v286_v9 = vpack.c.bf16 %v37_v7, %v36_v6  ;;  %v38_v10 = vld [vmem:[%s431_s2 + $0x30] sm:$0xff]  ;;  %v39_v11 = vld [vmem:[%s431_s2 + $0x38] sm:$0xff]  ;;  %28 = vst.msk [vmem:[#allocation4] sm:$0xff] %vm23_vm1, %v321_v28  ;;  %v137_v39 = vand.u32 127, %v136_v36 }
   0x4   :  { %279 = vmatprep.subr.bf16.mxu0 %v278_v3  ;;  %275 = vmatprep.mubr.msk.f32.mxu0 %vm51_vm0, %v30_v8  ;;  %v290_v12 = vpack.c.bf16 %v39_v11, %v38_v10  ;;  %v40_v13 = vld [vmem:[%s431_s2 + $0x40] sm:$0xff]  ;;  %v41_v14 = vld [vmem:[%s431_s2 + $0x48] sm:$0xff]  ;;  %v42_v16 = vld [vmem:[%s431_s2 + $0x50] sm:$0xff]  ;;  %26 = vst.msk [vmem:[#allocation3] sm:$0xff] %vm23_vm1, %v321_v28 }
   0x5   :  { %281 = vmatpush3.bf16.msra.mxu0 %v278_v3  ;;  %v294_v15 = vpack.c.bf16 %v41_v14, %v40_v13  ;;  %v43_v17 = vld [vmem:[%s431_s2 + $0x58] sm:$0xff]  ;;  %v31_v19 = vld [vmem:[%s432_s1 + $0x8] sm:$0xff]  ;;  %v234_v22 = vld [vmem:[%s433_s3] ss:$0 sm:$0xff]  ;;  %27 = vst.msk [vmem:[#allocation3 + $0x8] sm:$0xff] %vm23_vm1, %v321_v28 }
   0x6   :  { %283 = vmatprep.subr.bf16.mxu0 %v282_v5  ;;  %v298_v18 = vpack.c.bf16 %v43_v17, %v42_v16  ;;  %v140_v27 = vld [vmem:[%s435_s0] sm:$0xff]  ;;  %29 = vst.msk [vmem:[#allocation4 + $0x8] sm:$0xff] %vm23_vm1, %v321_v28  ;;  %v141_v38 = vld [vmem:[%s435_s0 + $0x8] sm:$0xff] }
   0x8   :  { %v163_v29 = vld [vmem:[#allocation2] sm:$0xff] }
   0x9   :  { %285 = vmatpush3.bf16.msra.mxu0 %v282_v5  ;;  %v164_v32 = vld [vmem:[#allocation2 + $0x8] sm:$0xff] }
   0xa   :  { %287 = vmatprep.subr.bf16.mxu0 %v286_v9  ;;  %v150_v52 = vld [vmem:[#allocation4] sm:$0xff] }
   0xb   :  { %v171_v58 = vld [vmem:[#allocation3] sm:$0xff] }
   0xc   :  { %v172_v62 = vld [vmem:[#allocation3 + $0x8] sm:$0xff] }
   0xd   :  { %289 = vmatpush3.bf16.msra.mxu0 %v286_v9  ;;  %v151_v3 = vld [vmem:[#allocation4 + $0x8] sm:$0xff] }
   0xe   :  { %291 = vmatprep.subr.bf16.mxu0 %v290_v12 }
  0x11   :  { %293 = vmatpush3.bf16.msra.mxu0 %v290_v12 }
  0x12   :  { %295 = vmatprep.subr.bf16.mxu0 %v294_v15 }
  0x15   :  { %297 = vmatpush3.bf16.msra.mxu0 %v294_v15 }
  0x16   :  { %299 = vmatprep.subr.bf16.mxu0 %v298_v18 }
  0x19   :  { %301 = vmatpush3.bf16.msra.mxu0 %v298_v18 }
  0x1c   :  { %276 = vmatmul.mubr.msk.f32.vlgmr.msra.gmra.mrb[0].mxu0 %vm51_vm0, %v31_v19 }
  0xef   :  { %v277_v23 = vpop.f32.mrb[0].mxu0 }
  0xf0   :  { %v130_v24 = vadd.f32 %v277_v23, %v234_v22  ;;  %v124_v25 = vpop.f32.mrb[1].mxu0 }
  0xf1   :  { %v125_v26 = vadd.f32 %v234_v22, %v124_v25 }
  0xf2   :  { %134 = vst [vmem:[%s434_s4 + $0x8] sm:$0xff] %v130_v24 }
  0xf3   :  { %133 = vst [vmem:[%s434_s4] sm:$0xff] %v125_v26  ;;  %165 = vmax.xlane.f32.xlu0 %v125_v26 }
  0xf7   :  { %167 = vmax.xlane.f32.xlu0 %v130_v24 }
 0x10d   :  { %143 = vperm.xlu0 %306, %v140_v27  }
 0x180   :  { %v166_v30 = vpop.xlane.xlu0 %165 }
 0x181   :  { %v169_v31 = vmax.f32 %v163_v29, %v166_v30 }
 0x183   :  { %v173_v33 = vsub.f32 %v163_v29, %v169_v31  ;;  %205 = vst.msk [vmem:[#allocation2] sm:$0xff] %vm23_vm1, %v169_v31  ;;  %183 = vperm.xlu1 %305, %v169_v31  }
 0x184   :  { %v168_v34 = vpop.xlane.xlu0 %167 }
 0x185   :  { %v170_v35 = vmax.f32 %v164_v32, %v168_v34  ;;  %v175_v55 = vmul.f32 1.442695, %v173_v33 }
 0x187   :  { %v174_v37 = vsub.f32 %v164_v32, %v170_v35  ;;  %206 = vst.msk [vmem:[#allocation2 + $0x8] sm:$0xff] %vm23_vm1, %v170_v35  ;;  %188 = vperm.xlu1 %305, %v170_v35  }
 0x189   :  { %v177_v56 = vmul.f32 1.442695, %v174_v37 }
 0x18a   :  { %v210_v10 = vld [vmem:[#allocation2] sm:$0xff] }
 0x18b   :  { %146 = vperm.xlu1 %305, %v141_v38  }
 0x18c   :  { %v144_v40 = vpop.permute.xlu0 %143 }
 0x18d   :  { %vm148_vm2 = vcmp.eq.s32.totalorder %v137_v39, %v144_v40 }
 0x18e   :  { %v152_v41 = vsel %vm148_vm2, %v125_v26, 0.0  ;;  %v211_v16 = vld [vmem:[#allocation2 + $0x8] sm:$0xff] }
 0x18f   :  { %154 = vadd.xlane.f32.xlu0 %v152_v41 }
 0x202   :  { %v184_v42 = vpop.permute.xlu1 %183 }
 0x203   :  { %v191_v43 = vsub.f32 %v125_v26, %v184_v42 }
 0x205   :  { %v193_v44 = vmul.f32 1.442695, %v191_v43 }
 0x206   :  { %v189_v45 = vpop.permute.xlu1 %188 }
 0x207   :  { %307 = vpow2.f32 %v193_v44  ;;  %v192_v46 = vsub.f32 %v130_v24, %v189_v45 }
 0x209   :  { %v195_v47 = vmul.f32 1.442695, %v192_v46 }
 0x20a   :  { %v147_v49 = vpop.permute.xlu1 %146 }
 0x20b   :  { %309 = vpow2.f32 %v195_v47  ;;  %vm149_vm3 = vcmp.eq.s32.totalorder %v137_v39, %v147_v49 }
 0x20c   :  { %v153_v51 = vsel %vm149_vm3, %v130_v24, 0.0  ;;  %311 = vpow2.f32 %v175_v55 }
 0x20d   :  { %313 = vpow2.f32 %v177_v56 }
 0x211   :  { %v308_v48 = vpop.eup %307 }
 0x212   :  { %197 = vadd.xlane.f32.xlu1 %v308_v48 }
 0x215   :  { %v310_v50 = vpop.eup %309 }
 0x216   :  { %199 = vadd.xlane.f32.xlu1 %v310_v50  ;;  %v312_v57 = vpop.eup %311 }
 0x217   :  { %v179_v59 = vmul.f32 %v312_v57, %v171_v58  ;;  %v314_v60 = vpop.eup %313 }
 0x218   :  { %v180_v0 = vmul.f32 %v314_v60, %v172_v62 }
 0x21a   :  { %156 = vadd.xlane.f32.xlu1 %v153_v51 }
 0x21c   :  { %v155_v53 = vpop.xlane.xlu0 %154 }
 0x21d   :  { %v158_v54 = vadd.f32 %v155_v53, %v150_v52 }
 0x21f   :  { %161 = vst.msk [vmem:[#allocation4] sm:$0xff] %vm23_vm1, %v158_v54 }
 0x226   :  { %v220_v13 = vld [vmem:[#allocation4] sm:$0xff] }
 0x29f   :  { %v198_v61 = vpop.xlane.xlu1 %197 }
 0x2a0   :  { %v201_v63 = vadd.f32 %v198_v61, %v179_v59 }
 0x2a2   :  { %203 = vst.msk [vmem:[#allocation3] sm:$0xff] %vm23_vm1, %v201_v63 }
 0x2a3   :  { %v200_v1 = vpop.xlane.xlu1 %199 }
 0x2a4   :  { %v202_v2 = vadd.f32 %v200_v1, %v180_v0 }
 0x2a6   :  { %204 = vst.msk [vmem:[#allocation3 + $0x8] sm:$0xff] %vm23_vm1, %v202_v2 }
 0x2a7   :  { %v157_v4 = vpop.xlane.xlu1 %156 }
 0x2a8   :  { %v159_v5 = vadd.f32 %v157_v4, %v151_v3 }
 0x2a9   :  { %v212_v6 = vld [vmem:[#allocation3] sm:$0xff] }
 0x2aa   :  { %315 = vlog2.f32 %v212_v6  ;;  %162 = vst.msk [vmem:[#allocation4 + $0x8] sm:$0xff] %vm23_vm1, %v159_v5 }
 0x2ad   :  { %v213_v7 = vld [vmem:[#allocation3 + $0x8] sm:$0xff] }
 0x2ae   :  { %317 = vlog2.f32 %v213_v7 }
 0x2b1   :  { %v221_v18 = vld [vmem:[#allocation4 + $0x8] sm:$0xff] }
 0x2b4   :  { %v316_v8 = vpop.eup %315 }
 0x2b5   :  { %v215_v9 = vmul.f32 0.6931472, %v316_v8 }
 0x2b7   :  { %v218_v11 = vadd.f32 %v215_v9, %v210_v10 }
 0x2b8   :  { %v318_v12 = vpop.eup %317 }
 0x2b9   :  { %v222_v14 = vsub.f32 %v218_v11, %v220_v13  ;;  %v217_v15 = vmul.f32 0.6931472, %v318_v12 }
 0x2bb   :  { %v219_v17 = vadd.f32 %v217_v15, %v211_v16  ;;  %224 = vst.msk [vmem:[%s436_s5] sm:$0xff] %vm23_vm1, %v222_v14 }
 0x2bd   :  { %v223_v19 = vsub.f32 %v219_v17, %v221_v18 }
 0x2bf   :  { %225 = vst.msk [vmem:[%s436_s5 + $0x8] sm:$0xff] %vm23_vm1, %v223_v19 }

// kernel: renet_forward.2
= control target key start
LH: loop header
LB: loop body
LE: loop exit
PB: predicated region body
PF: predicated region fallthrough
CT: control target
= control target key end

     0   :  { %v828_v3 = vmov 0.0   ;;  %v829_v7 = vmov 0   ;;  %s830_s24 = smov 64   ;;  %vm32_vm4 = vcmask 261120   ;;  %s1030_s2 = inlined_call_operand.vmem [shape: f32[32,96], index: 2, kind: input, shape index: {}]   ;;  %s1031_s3 = inlined_call_operand.vmem [shape: f32[1,96], index: 3, kind: input, shape index: {}]   ;;  %s1032_s1 = inlined_call_operand.vmem [shape: f32[4,16,96], index: 1, kind: input, shape index: {}]   ;;  %s1033_s0 = inlined_call_operand.vmem [shape: s32[16,1], index: 0, kind: input, shape index: {}]   ;;  %s1034_s4 = inlined_call_operand.vmem [shape: f32[16,32], index: 4, kind: output, shape index: {}]  }
   0x1   :  { %v17_v0 = vld [vmem:[%s1030_s2] sm:$0xff]  ;;  %v18_v1 = vld [vmem:[%s1030_s2 + $0x8] sm:$0xff]  ;;  %v19_v2 = vld [vmem:[%s1030_s2 + $0x10] sm:$0xff]  ;;  %706 = vmatprep.mubr.f32.mxu0 %v828_v3  ;;  %779 = vset.pattern.permute.xlu1 %v829_v7 }
   0x2   :  { %v866_v4 = vpack.c.bf16 %v18_v1, %v17_v0  ;;  %v20_v5 = vld [vmem:[%s1030_s2 + $0x18] sm:$0xff]  ;;  %778 = vset.pattern.permute.xlu0 %v829_v7  ;;  %v891_v8 = vld [vmem:[%s1031_s3] ss:$0 sm:$0xff]  ;;  %v25_v15 = vld [vmem:[%s1032_s1 + $0x8] sm:$0xff] }
   0x3   :  { %v871_v6 = vpack.c.bf16 %v20_v5, %v19_v2  ;;  %v24_v13 = vld [vmem:[%s1032_s1] sm:$0xff]  ;;  %v913_v28 = vld [vmem:[%s1033_s0 + $0x8] sm:$0xff]  ;;  %v657_v59 = vld [vmem:[%s1032_s1 + $0x18] sm:$0xff] }
   0x4   :  { %743 = vmatprep.subr.bf16.mxu0 %v866_v4  ;;  %751 = vmatprep.subr.bf16.mxu1 %v866_v4  ;;  %v906_v22 = vld [vmem:[%s1033_s0] sm:$0xff]  ;;  %vm164_vm1 = vcmp.gt.s32.totalorder %v913_v28, 0  ;;  %s831_s0 = smov 96   ;;  %v656_v60 = vld [vmem:[%s1032_s1 + $0x10] sm:$0xff]  ;;  %vm318_vm5 = vcmp.gt.s32.totalorder %v913_v28, 1  ;;  %vm472_vm9 = vcmp.gt.s32.totalorder %v913_v28, 2 }
   0x5   :  { %745 = vmatpush3.bf16.msra.mxu0 %v866_v4  ;;  %753 = vmatpush3.bf16.msra.mxu1 %v866_v4  ;;  %vm163_vm0 = vcmp.gt.s32.totalorder %v906_v22, 0  ;;  %v166_v32 = vsel %vm164_vm1, 1, %v829_v7  ;;  %vm317_vm6 = vcmp.gt.s32.totalorder %v906_v22, 1  ;;  %vm471_vm10 = vcmp.gt.s32.totalorder %v906_v22, 2 }
   0x6   :  { %747 = vmatprep.subr.bf16.mxu0 %v871_v6  ;;  %755 = vmatprep.subr.bf16.mxu1 %v871_v6  ;;  %v165_v23 = vsel %vm163_vm0, 1, %v829_v7  ;;  %vm626_vm13 = vcmp.gt.s32.totalorder %v913_v28, 3  ;;  %vm625_vm14 = vcmp.gt.s32.totalorder %v906_v22, 3 }
   0x9   :  { %749 = vmatpush3.bf16.msra.mxu0 %v871_v6  ;;  %757 = vmatpush3.bf16.msra.mxu1 %v871_v6 }
   0xa   :  { %759 = vmatprep.subr.bf16.mxu0 %v866_v4  ;;  %767 = vmatprep.subr.bf16.mxu1 %v866_v4 }
   0xc   :  { %707 = vmatmul.mubr.f32.vlgmr.msra.gmra.mrb[0].mxu0 %v828_v3 }
   0xd   :  { %761 = vmatpush3.bf16.msra.mxu0 %v866_v4 }
   0xe   :  { %763 = vmatprep.subr.bf16.mxu0 %v871_v6 }
  0x11   :  { %765 = vmatpush3.bf16.msra.mxu0 %v871_v6 }
  0xdf   :  { %v708_v9 = vpop.f32.mrb[0].mxu0 }
  0xe0   :  { %v102_v10 = vpop.f32.mrb[1].mxu0  ;;  %v108_v12 = vadd.f32 %v708_v9, %v891_v8 }
  0xe1   :  { %v103_v11 = vadd.f32 %v891_v8, %v102_v10 }
  0xe2   :  { %v112_v16 = vadd.f32 %v108_v12, %v25_v15 }
  0xe3   :  { %127 = vrot.lane.b32.xlu0 %v103_v11, %s830_s24  ;;  %v111_v14 = vadd.f32 %v103_v11, %v24_v13 }
  0xe4   :  { %v655_v18 = vmul.f32 -1.442695, %v112_v16 }
  0xe5   :  { %v654_v17 = vmul.f32 -1.442695, %v111_v14  ;;  %v319_v14 = vsel %vm317_vm6, 1, %v829_v7 }
  0xe7   :  { %129 = vrot.lane.b32.xlu0 %v108_v12, %s830_s24  ;;  %780 = vpow2.f32 %v654_v17 }
  0xe8   :  { %782 = vpow2.f32 %v655_v18 }
  0xeb   :  { %168 = vperm.xlu0 %778, %v165_v23  }
  0xf1   :  { %v781_v19 = vpop.eup %780 }
  0xf2   :  { %v119_v20 = vadd.f32 1.0, %v781_v19  ;;  %v783_v21 = vpop.eup %782 }
  0xf3   :  { %v120_v24 = vadd.f32 1.0, %v783_v21 }
  0xf4   :  { %784 = vrcp.f32 %v119_v20 }
  0xf5   :  { %786 = vrcp.f32 %v120_v24 }
  0xfe   :  { %v785_v25 = vpop.eup %784 }
  0xff   :  { %v787_v29 = vpop.eup %786  ;;  %v147_v41 = vsub.f32 1.0, %v785_v25  ;;  %v159_v43 = vmul.f32 0.0, %v785_v25 }
 0x100   :  { %v148_v46 = vsub.f32 1.0, %v787_v29  ;;  %v160_v49 = vmul.f32 0.0, %v787_v29 }
 0x155   :  { %v128_v26 = vpop.permute.xlu0 %127 }
 0x156   :  { %v133_v27 = vmul.f32 %v785_v25, %v128_v26 }
 0x158   :  { %137 = vrot.lane.b32.xlu1 %v133_v27, %s830_s24 }
 0x159   :  { %v130_v30 = vpop.permute.xlu0 %129 }
 0x15a   :  { %v134_v31 = vmul.f32 %v787_v29, %v130_v30 }
 0x15c   :  { %139 = vrot.lane.b32.xlu1 %v134_v31, %s830_s24 }
 0x160   :  { %171 = vperm.xlu1 %779, %v166_v32  }
 0x16a   :  { %v169_v40 = vpop.permute.xlu0 %168 }
 0x16b   :  { %vm173_vm2 = vcmp.eq.s32.totalorder %v169_v40, 1 }
 0x1ca   :  { %v138_v33 = vpop.permute.xlu1 %137 }
 0x1cb   :  { %v143_v34 = vadd.f32 %v138_v33, %v24_v13  ;;  %v320_v13 = vsel %vm318_vm5, 1, %v829_v7 }
 0x1cd   :  { %788 = vtanh.f32 %v143_v34 }
 0x1ce   :  { %v140_v35 = vpop.permute.xlu1 %139 }
 0x1cf   :  { %v144_v36 = vadd.f32 %v140_v35, %v25_v15 }
 0x1d1   :  { %790 = vtanh.f32 %v144_v36 }
 0x1d7   :  { %v789_v37 = vpop.eup %788 }
 0x1d8   :  { %151 = vrot.lane.b32.xlu1 %v789_v37, %s831_s0 }
 0x1db   :  { %v791_v38 = vpop.eup %790 }
 0x1dc   :  { %153 = vrot.lane.b32.xlu0 %v791_v38, %s831_s0 }
 0x1df   :  { %v172_v39 = vpop.permute.xlu1 %171 }
 0x1e0   :  { %vm174_vm3 = vcmp.eq.s32.totalorder %v172_v39, 1 }
 0x24a   :  { %v152_v42 = vpop.permute.xlu1 %151 }
 0x24b   :  { %v157_v44 = vmul.f32 %v152_v42, %v147_v41 }
 0x24d   :  { %v161_v45 = vadd.f32 %v159_v43, %v157_v44  ;;  %v663_v43 = vld [vmem:[%s1032_s1 + $0x28] sm:$0xff]  ;;  %v662_v44 = vld [vmem:[%s1032_s1 + $0x20] sm:$0xff] }
 0x24e   :  { %v154_v47 = vpop.permute.xlu0 %153 }
 0x24f   :  { %v921_v48 = vsel %vm173_vm2, %v161_v45, 0.0  ;;  %v158_v50 = vmul.f32 %v154_v47, %v148_v46 }
 0x250   :  { %182 = vrot.lane.b32.xlu1 %v921_v48, %s831_s0 }
 0x251   :  { %v162_v51 = vadd.f32 %v160_v49, %v158_v50 }
 0x253   :  { %v925_v52 = vsel %vm174_vm3, %v162_v51, 0.0 }
 0x254   :  { %184 = vrot.lane.b32.xlu0 %v925_v52, %s831_s0 }
 0x2c2   :  { %v183_v53 = vpop.permute.xlu1 %182 }
 0x2c3   :  { %717 = vmatprep.mubr.msk.f32.mxu1 %vm32_vm4, %v183_v53 }
 0x2c6   :  { %v185_v54 = vpop.permute.xlu0 %184 }
 0x2c7   :  { %718 = vmatmul.mubr.msk.f32.vlgmr.msra.gmra.mrb[0].mxu1 %vm32_vm4, %v185_v54 }
 0x2c8   :  { %769 = vmatpush3.bf16.msra.mxu1 %v866_v4 }
 0x2c9   :  { %771 = vmatprep.subr.bf16.mxu1 %v871_v6 }
 0x2cc   :  { %773 = vmatpush3.bf16.msra.mxu1 %v871_v6 }
 0x39a   :  { %v719_v55 = vpop.f32.mrb[0].mxu1 }
 0x39b   :  { %v262_v56 = vadd.f32 %v719_v55, %v891_v8  ;;  %v256_v57 = vpop.f32.mrb[1].mxu1 }
 0x39c   :  { %v257_v58 = vadd.f32 %v891_v8, %v256_v57 }
 0x39d   :  { %283 = vrot.lane.b32.xlu0 %v262_v56, %s830_s24  ;;  %v266_v61 = vadd.f32 %v657_v59, %v262_v56 }
 0x39e   :  { %281 = vrot.lane.b32.xlu1 %v257_v58, %s830_s24  ;;  %v265_v62 = vadd.f32 %v656_v60, %v257_v58 }
 0x39f   :  { %v661_v63 = vmul.f32 -1.442695, %v266_v61 }
 0x3a0   :  { %v660_v0 = vmul.f32 -1.442695, %v265_v62 }
 0x3a1   :  { %792 = vpow2.f32 %v661_v63 }
 0x3a2   :  { %794 = vpow2.f32 %v660_v0 }
 0x3ab   :  { %v793_v1 = vpop.eup %792 }
 0x3ac   :  { %v795_v2 = vpop.eup %794  ;;  %v274_v3 = vadd.f32 1.0, %v793_v1 }
 0x3ad   :  { %v273_v4 = vadd.f32 1.0, %v795_v2 }
 0x3ae   :  { %796 = vrcp.f32 %v274_v3 }
 0x3af   :  { %798 = vrcp.f32 %v273_v4 }
 0x3b8   :  { %v797_v5 = vpop.eup %796 }
 0x3b9   :  { %v799_v9 = vpop.eup %798  ;;  %v302_v24 = vsub.f32 1.0, %v797_v5  ;;  %v314_v27 = vmul.f32 %v797_v5, %v925_v52 }
 0x3ba   :  { %v301_v26 = vsub.f32 1.0, %v799_v9  ;;  %v313_v31 = vmul.f32 %v799_v9, %v921_v48 }
 0x40f   :  { %v284_v6 = vpop.permute.xlu0 %283 }
 0x410   :  { %v288_v10 = vmul.f32 %v797_v5, %v284_v6  ;;  %v282_v11 = vpop.permute.xlu1 %281 }
 0x411   :  { %v287_v12 = vmul.f32 %v799_v9, %v282_v11 }
 0x412   :  { %293 = vrot.lane.b32.xlu0 %v288_v10, %s830_s24 }
 0x413   :  { %291 = vrot.lane.b32.xlu1 %v287_v12, %s830_s24 }
 0x416   :  { %325 = vperm.xlu0 %778, %v320_v13  }
 0x417   :  { %322 = vperm.xlu1 %779, %v319_v14  }
 0x484   :  { %v294_v15 = vpop.permute.xlu0 %293 }
 0x485   :  { %v298_v16 = vadd.f32 %v657_v59, %v294_v15  ;;  %v292_v17 = vpop.permute.xlu1 %291  ;;  %v474_v59 = vsel %vm472_vm9, 1, %v829_v7 }
 0x486   :  { %v297_v18 = vadd.f32 %v656_v60, %v292_v17  ;;  %v473_v60 = vsel %vm471_vm10, 1, %v829_v7 }
 0x487   :  { %800 = vtanh.f32 %v298_v16 }
 0x488   :  { %802 = vtanh.f32 %v297_v18 }
 0x491   :  { %v801_v19 = vpop.eup %800 }
 0x492   :  { %v803_v20 = vpop.eup %802  ;;  %307 = vrot.lane.b32.xlu0 %v801_v19, %s831_s0 }
 0x493   :  { %305 = vrot.lane.b32.xlu1 %v803_v20, %s831_s0 }
 0x495   :  { %v326_v21 = vpop.permute.xlu0 %325 }
 0x496   :  { %v323_v23 = vpop.permute.xlu1 %322  ;;  %vm328_vm7 = vcmp.eq.s32.totalorder %v326_v21, 1 }
 0x497   :  { %vm327_vm8 = vcmp.eq.s32.totalorder %v323_v23, 1 }
 0x504   :  { %v308_v25 = vpop.permute.xlu0 %307 }
 0x505   :  { %v312_v29 = vmul.f32 %v308_v25, %v302_v24  ;;  %v306_v30 = vpop.permute.xlu1 %305 }
 0x506   :  { %v311_v32 = vmul.f32 %v306_v30, %v301_v26  ;;  %v669_v26 = vld [vmem:[%s1032_s1 + $0x38] sm:$0xff] }
 0x507   :  { %v316_v33 = vadd.f32 %v314_v27, %v312_v29  ;;  %v668_v27 = vld [vmem:[%s1032_s1 + $0x30] sm:$0xff] }
 0x508   :  { %v315_v34 = vadd.f32 %v313_v31, %v311_v32 }
 0x509   :  { %v955_v35 = vsel %vm328_vm7, %v316_v33, %v925_v52 }
 0x50a   :  { %338 = vrot.lane.b32.xlu0 %v955_v35, %s831_s0  ;;  %v960_v36 = vsel %vm327_vm8, %v315_v34, %v921_v48 }
 0x50b   :  { %336 = vrot.lane.b32.xlu1 %v960_v36, %s831_s0 }
 0x57c   :  { %v339_v38 = vpop.permute.xlu0 %338 }
 0x57d   :  { %v337_v37 = vpop.permute.xlu1 %336 }
 0x57e   :  { %728 = vmatprep.mubr.msk.f32.mxu0 %vm32_vm4, %v337_v37 }
 0x57f   :  { %729 = vmatmul.mubr.msk.f32.vlgmr.msra.gmra.mrb[2].mxu0 %vm32_vm4, %v339_v38 }
 0x652   :  { %v730_v39 = vpop.f32.mrb[2].mxu0 }
 0x653   :  { %v416_v40 = vadd.f32 %v730_v39, %v891_v8  ;;  %v410_v41 = vpop.f32.mrb[3].mxu0 }
 0x654   :  { %v411_v42 = vadd.f32 %v891_v8, %v410_v41 }
 0x655   :  { %437 = vrot.lane.b32.xlu0 %v416_v40, %s830_s24  ;;  %v420_v45 = vadd.f32 %v663_v43, %v416_v40 }
 0x656   :  { %435 = vrot.lane.b32.xlu1 %v411_v42, %s830_s24  ;;  %v419_v46 = vadd.f32 %v662_v44, %v411_v42  ;;  %v628_v42 = vsel %vm626_vm13, 1, %v829_v7 }
 0x657   :  { %v667_v47 = vmul.f32 -1.442695, %v420_v45 }
 0x658   :  { %v666_v48 = vmul.f32 -1.442695, %v419_v46 }
 0x659   :  { %804 = vpow2.f32 %v667_v47 }
 0x65a   :  { %806 = vpow2.f32 %v666_v48 }
 0x663   :  { %v805_v49 = vpop.eup %804 }
 0x664   :  { %v807_v50 = vpop.eup %806  ;;  %v428_v51 = vadd.f32 1.0, %v805_v49 }
 0x665   :  { %v427_v52 = vadd.f32 1.0, %v807_v50 }
 0x666   :  { %808 = vrcp.f32 %v428_v51 }
 0x667   :  { %810 = vrcp.f32 %v427_v52 }
 0x670   :  { %v809_v53 = vpop.eup %808 }
 0x671   :  { %v811_v55 = vpop.eup %810  ;;  %v456_v5 = vsub.f32 1.0, %v809_v53  ;;  %v468_v10 = vmul.f32 %v809_v53, %v955_v35 }
 0x672   :  { %v455_v9 = vsub.f32 1.0, %v811_v55  ;;  %v467_v13 = vmul.f32 %v811_v55, %v960_v36 }
 0x6c7   :  { %v438_v54 = vpop.permute.xlu0 %437 }
 0x6c8   :  { %v442_v56 = vmul.f32 %v809_v53, %v438_v54  ;;  %v436_v57 = vpop.permute.xlu1 %435 }
 0x6c9   :  { %v441_v58 = vmul.f32 %v811_v55, %v436_v57 }
 0x6ca   :  { %447 = vrot.lane.b32.xlu0 %v442_v56, %s830_s24 }
 0x6cb   :  { %445 = vrot.lane.b32.xlu1 %v441_v58, %s830_s24 }
 0x6ce   :  { %479 = vperm.xlu0 %778, %v474_v59  }
 0x6cf   :  { %476 = vperm.xlu1 %779, %v473_v60  }
 0x73c   :  { %v448_v61 = vpop.permute.xlu0 %447 }
 0x73d   :  { %v452_v62 = vadd.f32 %v663_v43, %v448_v61  ;;  %v446_v63 = vpop.permute.xlu1 %445  ;;  %v627_v43 = vsel %vm625_vm14, 1, %v829_v7 }
 0x73e   :  { %v451_v0 = vadd.f32 %v662_v44, %v446_v63 }
 0x73f   :  { %812 = vtanh.f32 %v452_v62 }
 0x740   :  { %814 = vtanh.f32 %v451_v0 }
 0x749   :  { %v813_v1 = vpop.eup %812 }
 0x74a   :  { %v815_v2 = vpop.eup %814  ;;  %461 = vrot.lane.b32.xlu0 %v813_v1, %s831_s0 }
 0x74b   :  { %459 = vrot.lane.b32.xlu1 %v815_v2, %s831_s0 }
 0x74d   :  { %v480_v3 = vpop.permute.xlu0 %479 }
 0x74e   :  { %v477_v4 = vpop.permute.xlu1 %476  ;;  %vm482_vm11 = vcmp.eq.s32.totalorder %v480_v3, 1 }
 0x74f   :  { %vm481_vm12 = vcmp.eq.s32.totalorder %v477_v4, 1 }
 0x7bc   :  { %v462_v6 = vpop.permute.xlu0 %461 }
 0x7bd   :  { %v466_v11 = vmul.f32 %v462_v6, %v456_v5  ;;  %v460_v12 = vpop.permute.xlu1 %459 }
 0x7be   :  { %v465_v14 = vmul.f32 %v460_v12, %v455_v9 }
 0x7bf   :  { %v470_v15 = vadd.f32 %v468_v10, %v466_v11 }
 0x7c0   :  { %v469_v16 = vadd.f32 %v467_v13, %v465_v14 }
 0x7c1   :  { %v987_v17 = vsel %vm482_vm11, %v470_v15, %v955_v35 }
 0x7c2   :  { %492 = vrot.lane.b32.xlu0 %v987_v17, %s831_s0  ;;  %v992_v18 = vsel %vm481_vm12, %v469_v16, %v960_v36 }
 0x7c3   :  { %490 = vrot.lane.b32.xlu1 %v992_v18, %s831_s0 }
 0x834   :  { %v493_v20 = vpop.permute.xlu0 %492 }
 0x835   :  { %v491_v19 = vpop.permute.xlu1 %490 }
 0x836   :  { %739 = vmatprep.mubr.msk.f32.mxu1 %vm32_vm4, %v491_v19 }
 0x837   :  { %740 = vmatmul.mubr.msk.f32.vlgmr.msra.gmra.mrb[2].mxu1 %vm32_vm4, %v493_v20 }
 0x90a   :  { %v741_v21 = vpop.f32.mrb[2].mxu1 }
 0x90b   :  { %v570_v23 = vadd.f32 %v741_v21, %v891_v8  ;;  %v564_v24 = vpop.f32.mrb[3].mxu1 }
 0x90c   :  { %v565_v25 = vadd.f32 %v891_v8, %v564_v24 }
 0x90d   :  { %591 = vrot.lane.b32.xlu0 %v570_v23, %s830_s24  ;;  %v574_v29 = vadd.f32 %v669_v26, %v570_v23 }
 0x90e   :  { %589 = vrot.lane.b32.xlu1 %v565_v25, %s830_s24  ;;  %v573_v30 = vadd.f32 %v668_v27, %v565_v25 }
 0x90f   :  { %v673_v31 = vmul.f32 -1.442695, %v574_v29 }
 0x910   :  { %v672_v32 = vmul.f32 -1.442695, %v573_v30 }
 0x911   :  { %816 = vpow2.f32 %v673_v31 }
 0x912   :  { %818 = vpow2.f32 %v672_v32 }
 0x91b   :  { %v817_v33 = vpop.eup %816 }
 0x91c   :  { %v819_v8 = vpop.eup %818  ;;  %v582_v34 = vadd.f32 1.0, %v817_v33 }
 0x91d   :  { %v581_v35 = vadd.f32 1.0, %v819_v8 }
 0x91e   :  { %820 = vrcp.f32 %v582_v34 }
 0x91f   :  { %822 = vrcp.f32 %v581_v35 }
 0x928   :  { %v821_v36 = vpop.eup %820 }
 0x929   :  { %v823_v38 = vpop.eup %822  ;;  %v610_v50 = vsub.f32 1.0, %v821_v36  ;;  %v622_v7 = vmul.f32 %v821_v36, %v987_v17 }
 0x92a   :  { %v609_v52 = vsub.f32 1.0, %v823_v38  ;;  %v621_v55 = vmul.f32 %v823_v38, %v992_v18 }
 0x97f   :  { %v592_v37 = vpop.permute.xlu0 %591 }
 0x980   :  { %v596_v39 = vmul.f32 %v821_v36, %v592_v37  ;;  %v590_v40 = vpop.permute.xlu1 %589 }
 0x981   :  { %v595_v41 = vmul.f32 %v823_v38, %v590_v40 }
 0x982   :  { %601 = vrot.lane.b32.xlu0 %v596_v39, %s830_s24 }
 0x983   :  { %599 = vrot.lane.b32.xlu1 %v595_v41, %s830_s24 }
 0x986   :  { %633 = vperm.xlu0 %778, %v628_v42  }
 0x987   :  { %630 = vperm.xlu1 %779, %v627_v43  }
 0x9f4   :  { %v602_v44 = vpop.permute.xlu0 %601 }
 0x9f5   :  { %v606_v45 = vadd.f32 %v669_v26, %v602_v44  ;;  %v600_v46 = vpop.permute.xlu1 %599 }
 0x9f6   :  { %v605_v47 = vadd.f32 %v668_v27, %v600_v46 }
 0x9f7   :  { %824 = vtanh.f32 %v606_v45 }
 0x9f8   :  { %826 = vtanh.f32 %v605_v47 }
 0xa01   :  { %v825_v28 = vpop.eup %824 }
 0xa02   :  { %v827_v48 = vpop.eup %826  ;;  %615 = vrot.lane.b32.xlu0 %v825_v28, %s831_s0 }
 0xa03   :  { %613 = vrot.lane.b32.xlu1 %v827_v48, %s831_s0 }
 0xa05   :  { %v634_v22 = vpop.permute.xlu0 %633 }
 0xa06   :  { %v631_v49 = vpop.permute.xlu1 %630  ;;  %vm636_vm15 = vcmp.eq.s32.totalorder %v634_v22, 1 }
 0xa07   :  { %vm635_vm0 = vcmp.eq.s32.totalorder %v631_v49, 1 }
 0xa74   :  { %v616_v51 = vpop.permute.xlu0 %615 }
 0xa75   :  { %v620_v53 = vmul.f32 %v616_v51, %v610_v50  ;;  %v614_v54 = vpop.permute.xlu1 %613 }
 0xa76   :  { %v619_v56 = vmul.f32 %v614_v54, %v609_v52 }
 0xa77   :  { %v624_v57 = vadd.f32 %v622_v7, %v620_v53 }
 0xa78   :  { %v623_v58 = vadd.f32 %v621_v55, %v619_v56 }
 0xa79   :  { %v638_v59 = vsel %vm636_vm15, %v624_v57, %v987_v17 }
 0xa7a   :  { %643 = vrot.lane.b32.xlu0 %v638_v59, %s831_s0  ;;  %v637_v60 = vsel %vm635_vm0, %v623_v58, %v992_v18 }
 0xa7b   :  { %641 = vrot.lane.b32.xlu1 %v637_v60, %s831_s0 }
 0xaec   :  { %v644_v61 = vpop.permute.xlu0 %643 }
 0xaed   :  { %648 = vst.msk [vmem:[%s1034_s4 + $0x8] sm:$0xff] %vm32_vm4, %v644_v61  ;;  %v642_v62 = vpop.permute.xlu1 %641 }
 0xaee   :  { %647 = vst.msk [vmem:[%s1034_s4] sm:$0xff] %vm32_vm4, %v642_v62 }

</bundles_post_ra>
